<compile_context>
chip_gen: v7x
topology: tpu7x:2x2x1
jax: 0.10.0
libtpu: 0.0.40
codegen_flags: <defaults>
</compile_context>

<pallas_src>
import functools
import math

import jax
import jax.numpy as jnp
from jax.experimental import pallas as pl

DROPOUT_P = 0.5
BASE_SEED = 1234


def _attn_kernel(q_ref, k_ref, v_ref, wq_ref, wk_ref, wv_ref, wp_ref, o_ref,
                 *, dropout_p, seed):
    f32 = jnp.float32

    # Fused input projections.  The weights already carry every /head_dim
    # scale and the multiplicative "bias"; the V weight additionally carries
    # the 1/(1-p) dropout survivor scale.  One batched MXU contraction each.
    q = jnp.einsum("bsd,bdn->bsn", q_ref[...], wq_ref[...],
                   preferred_element_type=f32)
    k = jnp.einsum("bsd,bdn->bsn", k_ref[...], wk_ref[...],
                   preferred_element_type=f32)
    v = jnp.einsum("bsd,bdn->bsn", v_ref[...], wv_ref[...],
                   preferred_element_type=f32)

    # Attention scores + fused positional projection.
    qk = jnp.einsum("bsn,btn->bst", q, k, preferred_element_type=f32)
    qk = jnp.einsum("bst,btn->bsn", qk, wp_ref[...],
                    preferred_element_type=f32)

    # Softmax over the last axis.
    m = jnp.max(qk, axis=-1, keepdims=True)
    e = jnp.exp(qk - m)
    sm = e / jnp.sum(e, axis=-1, keepdims=True)

    # Dropout(p): integer-domain keep mask from a counter-hash PRNG
    # (murmur3 fmix32 of the element's linear index).  Uses only plain
    # lax/jnp integer ops, so it lowers on TPU Mosaic *and* interpret mode.
    # Survivor scaling 1/(1-p) is already folded into the fused V weight.
    # TODO(synk): not bit-identical to torch.nn.functional.dropout's RNG.
    bh, s, n = sm.shape
    b_i = jax.lax.broadcasted_iota(jnp.int32, sm.shape, 0)
    s_i = jax.lax.broadcasted_iota(jnp.int32, sm.shape, 1)
    n_i = jax.lax.broadcasted_iota(jnp.int32, sm.shape, 2)
    lin = (b_i * (s * n) + s_i * n + n_i).astype(jnp.uint32)
    x = lin * jnp.uint32(0x9E3779B9) + jnp.uint32(seed & 0xFFFFFFFF)
    x = x ^ (x >> 16)
    x = x * jnp.uint32(0x7FEB352D)
    x = x ^ (x >> 15)
    x = x * jnp.uint32(0x846CA68B)
    x = x ^ (x >> 16)
    threshold = jnp.uint32(min(int(dropout_p * 4294967296.0), 4294967295))
    keep = x >= threshold                      # P(keep) == 1 - p
    dropped = jnp.where(keep, sm, jnp.zeros_like(sm))

    # output = dropout(softmax(qk)) @ v   (v already scaled by 1/(1-p))
    o_ref[...] = jnp.einsum("bsk,bkn->bsn", dropped, v,
                            preferred_element_type=f32).astype(o_ref.dtype)


def _model_forward_impl(query, key, value, params, seed):
    B, H, S, D = query.shape
    hd = jnp.float32(D)                        # head_dim = query.shape[-1]

    # in_proj_weight_qkv.chunk(3) -> Wq, Wk, Wv  (each (N, N) after squeeze)
    wq, wk, wv = [c[0] for c in jnp.split(params["in_proj_weight_qkv"], 3, axis=0)]
    wd = params["pos_proj_weight_dropout"]                 # (N, N)
    bd = params["pos_proj_bias_dropout"].reshape(-1)       # (N,)
    wp = params["pos_proj_weight_qkv"][0]                  # (N, N)
    bp = params["pos_proj_bias_qkv"].reshape(-1)           # (N,)
    N = wd.shape[-1]

    # ---- Algebraic fusion (grid-invariant; computed once, outside kernel) ----
    wq_f = (wq @ wd) * bd[None, :] / hd**3
    wk_f = (wk @ wd) * bd[None, :] / hd**3
    wv_f = (wv @ wd) * bd[None, :] / hd**3 / (1.0 - DROPOUT_P)  # fold dropout scale
    wp_f = wp * bp[None, :] / hd**2

    BH = B * H
    qf = query.reshape(BH, S, D)
    kf = key.reshape(BH, S, D)
    vf = value.reshape(BH, S, D)

    # Broadcast the tiny fused weights over the batch-head axis so every
    # in-kernel contraction is a plain batched 3-D einsum (few KB total).
    wq_b = jnp.broadcast_to(wq_f, (BH, D, N))
    wk_b = jnp.broadcast_to(wk_f, (BH, D, N))
    wv_b = jnp.broadcast_to(wv_f, (BH, D, N))
    wp_b = jnp.broadcast_to(wp_f, (BH, N, N))

    kernel = functools.partial(_attn_kernel, dropout_p=DROPOUT_P, seed=seed)

    # Single gridless invocation: whole problem resident in VMEM, default
    # full-array blocks, no per-step pipeline overhead.
    out = pl.pallas_call(
        kernel,
        out_shape=jax.ShapeDtypeStruct((BH, S, N), jnp.float32),
    )(qf, kf, vf, wq_b, wk_b, wv_b, wp_b)

    return out.reshape(B, H, S, N)


_model_forward_jit = jax.jit(_model_forward_impl, static_argnums=(4,))


def model_forward(query, key, value, params, seed=BASE_SEED):
    return _model_forward_jit(query, key, value, params, seed)


if __name__ == "__main__":
    B, H, N = 2, 2, 8     # S = D = dim = n = N  (required by the module algebra)

    root = jax.random.PRNGKey(0)
    k1, k2, k3, k4, k5, k6, k7 = jax.random.split(root, 7)

    query = jax.random.normal(k1, (B, H, N, N), jnp.float32)
    key_ = jax.random.normal(k2, (B, H, N, N), jnp.float32)
    value = jax.random.normal(k3, (B, H, N, N), jnp.float32)

    scale_factor_init = math.sqrt(N)
    params = {
        "in_proj_weight_qkv": jax.random.normal(k4, (3, N, N), jnp.float32),
        "pos_proj_weight_qkv": jax.random.normal(k5, (1, N, N), jnp.float32),
        "in_proj_bias_qkv": jax.random.normal(k6, (1, N), jnp.float32),  # unused in forward
        "pos_proj_bias_qkv": jax.random.normal(k7, (1, N), jnp.float32),
        "pos_proj_weight_dropout": jnp.full((N, N), 1.0 / scale_factor_init, jnp.float32),
        "pos_proj_bias_dropout": jnp.full((N,), 1.0 / scale_factor_init, jnp.float32),
    }

    out = model_forward(query, key_, value, params)
    out = jax.block_until_ready(out)
    assert out.shape == (B, H, N, N), out.shape
    assert bool(jnp.all(jnp.isfinite(out)))
    print("KERNEL_OK")
</pallas_src>

<mosaic_0001>
module attributes {stable_mosaic.version = 11 : i64} {
  func.func @_attn_kernel(%arg0: memref<4x8x8xf32, #tpu.memory_space<vmem>>, %arg1: memref<4x8x8xf32, #tpu.memory_space<vmem>>, %arg2: memref<4x8x8xf32, #tpu.memory_space<vmem>>, %arg3: memref<4x8x8xf32, #tpu.memory_space<vmem>>, %arg4: memref<4x8x8xf32, #tpu.memory_space<vmem>>, %arg5: memref<4x8x8xf32, #tpu.memory_space<vmem>>, %arg6: memref<4x8x8xf32, #tpu.memory_space<vmem>>, %arg7: memref<4x8x8xf32, #tpu.memory_space<vmem>>) attributes {dimension_semantics = [], scalar_prefetch = 0 : i64, scratch_operands = 0 : i64, tpu.core_type = #tpu.core_type<tc>} {
    %c0 = arith.constant 0 : index
    %c0_0 = arith.constant 0 : index
    %c0_1 = arith.constant 0 : index
    %0 = vector.load %arg0[%c0, %c0_0, %c0_1] : memref<4x8x8xf32, #tpu.memory_space<vmem>>, vector<4x8x8xf32>
    %c0_2 = arith.constant 0 : index
    %c0_3 = arith.constant 0 : index
    %c0_4 = arith.constant 0 : index
    %1 = vector.load %arg3[%c0_2, %c0_3, %c0_4] : memref<4x8x8xf32, #tpu.memory_space<vmem>>, vector<4x8x8xf32>
    "tpu.trace_start"() <{level = 10 : i32, message = "bsd,bdn->bsn"}> : () -> ()
    %cst = arith.constant dense<0.000000e+00> : vector<4x8x8xf32>
    %2 = tpu.matmul %0, %1, %cst {dimension_numbers = #tpu.dot_dimension_numbers<[2], [1], [1], [2], [0, 0, 0, 1, 1, 2], [0], [0]>} : vector<4x8x8xf32>, vector<4x8x8xf32>, vector<4x8x8xf32> -> vector<4x8x8xf32>
    "tpu.trace_stop"() : () -> ()
    %c0_5 = arith.constant 0 : index
    %c0_6 = arith.constant 0 : index
    %c0_7 = arith.constant 0 : index
    %3 = vector.load %arg1[%c0_5, %c0_6, %c0_7] : memref<4x8x8xf32, #tpu.memory_space<vmem>>, vector<4x8x8xf32>
    %c0_8 = arith.constant 0 : index
    %c0_9 = arith.constant 0 : index
    %c0_10 = arith.constant 0 : index
    %4 = vector.load %arg4[%c0_8, %c0_9, %c0_10] : memref<4x8x8xf32, #tpu.memory_space<vmem>>, vector<4x8x8xf32>
    "tpu.trace_start"() <{level = 10 : i32, message = "bsd,bdn->bsn"}> : () -> ()
    %cst_11 = arith.constant dense<0.000000e+00> : vector<4x8x8xf32>
    %5 = tpu.matmul %3, %4, %cst_11 {dimension_numbers = #tpu.dot_dimension_numbers<[2], [1], [1], [2], [0, 0, 0, 1, 1, 2], [0], [0]>} : vector<4x8x8xf32>, vector<4x8x8xf32>, vector<4x8x8xf32> -> vector<4x8x8xf32>
    "tpu.trace_stop"() : () -> ()
    %c0_12 = arith.constant 0 : index
    %c0_13 = arith.constant 0 : index
    %c0_14 = arith.constant 0 : index
    %6 = vector.load %arg2[%c0_12, %c0_13, %c0_14] : memref<4x8x8xf32, #tpu.memory_space<vmem>>, vector<4x8x8xf32>
    %c0_15 = arith.constant 0 : index
    %c0_16 = arith.constant 0 : index
    %c0_17 = arith.constant 0 : index
    %7 = vector.load %arg5[%c0_15, %c0_16, %c0_17] : memref<4x8x8xf32, #tpu.memory_space<vmem>>, vector<4x8x8xf32>
    "tpu.trace_start"() <{level = 10 : i32, message = "bsd,bdn->bsn"}> : () -> ()
    %cst_18 = arith.constant dense<0.000000e+00> : vector<4x8x8xf32>
    %8 = tpu.matmul %6, %7, %cst_18 {dimension_numbers = #tpu.dot_dimension_numbers<[2], [1], [1], [2], [0, 0, 0, 1, 1, 2], [0], [0]>} : vector<4x8x8xf32>, vector<4x8x8xf32>, vector<4x8x8xf32> -> vector<4x8x8xf32>
    "tpu.trace_stop"() : () -> ()
    "tpu.trace_start"() <{level = 10 : i32, message = "bsn,btn->bst"}> : () -> ()
    %cst_19 = arith.constant dense<0.000000e+00> : vector<4x8x8xf32>
    %9 = tpu.matmul %2, %5, %cst_19 {dimension_numbers = #tpu.dot_dimension_numbers<[2], [2], [1], [1], [0, 0, 0, 1, 1, 1], [0], [0]>} : vector<4x8x8xf32>, vector<4x8x8xf32>, vector<4x8x8xf32> -> vector<4x8x8xf32>
    "tpu.trace_stop"() : () -> ()
    %c0_20 = arith.constant 0 : index
    %c0_21 = arith.constant 0 : index
    %c0_22 = arith.constant 0 : index
    %10 = vector.load %arg6[%c0_20, %c0_21, %c0_22] : memref<4x8x8xf32, #tpu.memory_space<vmem>>, vector<4x8x8xf32>
    "tpu.trace_start"() <{level = 10 : i32, message = "bst,btn->bsn"}> : () -> ()
    %cst_23 = arith.constant dense<0.000000e+00> : vector<4x8x8xf32>
    %11 = tpu.matmul %9, %10, %cst_23 {dimension_numbers = #tpu.dot_dimension_numbers<[2], [1], [1], [2], [0, 0, 0, 1, 1, 2], [0], [0]>} : vector<4x8x8xf32>, vector<4x8x8xf32>, vector<4x8x8xf32> -> vector<4x8x8xf32>
    "tpu.trace_stop"() : () -> ()
    %cst_24 = arith.constant dense<0xFF800000> : vector<4x8xf32>
    %12 = vector.multi_reduction <maximumf>, %11, %cst_24 [2] : vector<4x8x8xf32> to vector<4x8xf32>
    %13 = vector.shape_cast %12 : vector<4x8xf32> to vector<4x8x1xf32>
    %14 = vector.broadcast %13 : vector<4x8x1xf32> to vector<4x8x8xf32>
    %15 = arith.subf %11, %14 : vector<4x8x8xf32>
    %16 = math.exp %15 : vector<4x8x8xf32>
    %cst_25 = arith.constant dense<0.000000e+00> : vector<4x8xf32>
    %17 = vector.multi_reduction <add>, %16, %cst_25 [2] : vector<4x8x8xf32> to vector<4x8xf32>
    %18 = vector.shape_cast %17 : vector<4x8xf32> to vector<4x8x1xf32>
    %19 = vector.broadcast %18 : vector<4x8x1xf32> to vector<4x8x8xf32>
    %20 = arith.divf %16, %19 : vector<4x8x8xf32>
    %21 = tpu.iota {dimensions = array<i32: 0>} : vector<4x8x8xi32>
    %22 = tpu.iota {dimensions = array<i32: 1>} : vector<4x8x8xi32>
    %23 = tpu.iota {dimensions = array<i32: 2>} : vector<4x8x8xi32>
    %c64_i32 = arith.constant 64 : i32
    %24 = vector.broadcast %c64_i32 : i32 to vector<4x8x8xi32>
    %25 = arith.muli %21, %24 : vector<4x8x8xi32>
    %c8_i32 = arith.constant 8 : i32
    %26 = vector.broadcast %c8_i32 : i32 to vector<4x8x8xi32>
    %27 = arith.muli %22, %26 : vector<4x8x8xi32>
    %28 = arith.addi %25, %27 : vector<4x8x8xi32>
    %29 = arith.addi %28, %23 : vector<4x8x8xi32>
    %c-1640531527_i32 = arith.constant -1640531527 : i32
    %30 = vector.broadcast %c-1640531527_i32 : i32 to vector<4x8x8xi32>
    %31 = arith.muli %29, %30 : vector<4x8x8xi32>
    %c1234_i32 = arith.constant 1234 : i32
    %32 = vector.broadcast %c1234_i32 : i32 to vector<4x8x8xi32>
    %33 = arith.addi %31, %32 : vector<4x8x8xi32>
    %c16_i32 = arith.constant 16 : i32
    %34 = vector.broadcast %c16_i32 : i32 to vector<4x8x8xi32>
    %35 = arith.shrui %33, %34 : vector<4x8x8xi32>
    %36 = arith.xori %33, %35 : vector<4x8x8xi32>
    %c2146121005_i32 = arith.constant 2146121005 : i32
    %37 = vector.broadcast %c2146121005_i32 : i32 to vector<4x8x8xi32>
    %38 = arith.muli %36, %37 : vector<4x8x8xi32>
    %c15_i32 = arith.constant 15 : i32
    %39 = vector.broadcast %c15_i32 : i32 to vector<4x8x8xi32>
    %40 = arith.shrui %38, %39 : vector<4x8x8xi32>
    %41 = arith.xori %38, %40 : vector<4x8x8xi32>
    %c-2073254261_i32 = arith.constant -2073254261 : i32
    %42 = vector.broadcast %c-2073254261_i32 : i32 to vector<4x8x8xi32>
    %43 = arith.muli %41, %42 : vector<4x8x8xi32>
    %c16_i32_26 = arith.constant 16 : i32
    %44 = vector.broadcast %c16_i32_26 : i32 to vector<4x8x8xi32>
    %45 = arith.shrui %43, %44 : vector<4x8x8xi32>
    %46 = arith.xori %43, %45 : vector<4x8x8xi32>
    %c-2147483648_i32 = arith.constant -2147483648 : i32
    %47 = vector.broadcast %c-2147483648_i32 : i32 to vector<4x8x8xi32>
    %48 = arith.cmpi uge, %46, %47 : vector<4x8x8xi32>
    %cst_27 = arith.constant 0.000000e+00 : f32
    %49 = vector.broadcast %cst_27 : f32 to vector<4x8x8xf32>
    %50 = arith.select %48, %20, %49 : vector<4x8x8xi1>, vector<4x8x8xf32>
    "tpu.trace_start"() <{level = 10 : i32, message = "bsk,bkn->bsn"}> : () -> ()
    %cst_28 = arith.constant dense<0.000000e+00> : vector<4x8x8xf32>
    %51 = tpu.matmul %50, %8, %cst_28 {dimension_numbers = #tpu.dot_dimension_numbers<[2], [1], [1], [2], [0, 0, 0, 1, 1, 2], [0], [0]>} : vector<4x8x8xf32>, vector<4x8x8xf32>, vector<4x8x8xf32> -> vector<4x8x8xf32>
    "tpu.trace_stop"() : () -> ()
    %c0_29 = arith.constant 0 : index
    %c0_30 = arith.constant 0 : index
    %c0_31 = arith.constant 0 : index
    %52 = vector.load %arg7[%c0_29, %c0_30, %c0_31] : memref<4x8x8xf32, #tpu.memory_space<vmem>>, vector<4x8x8xf32>
    tpu.vector_store %arg7[%c0_29, %c0_30, %c0_31], %51 {strides = array<i32>} : memref<4x8x8xf32, #tpu.memory_space<vmem>>, vector<4x8x8xf32>,
    return
  }
}

</mosaic_0001>

<bundles_post_ra>
// kernel: _model_forward_impl.1
= control target key start
LH: loop header
LB: loop body
LE: loop exit
PB: predicated region body
PF: predicated region fallthrough
CT: control target
= control target key end

     0   :  { %v2185_v2 = vmov 0.0   ;;  %vm35_vm0 = vcmask 64512   ;;  %vm2186_vm1 = vmmov 0   ;;  %s2460_s0 = inlined_call_operand.vmem [shape: f32[4,8,8], index: 0, kind: input, shape index: {}]   ;;  %s2461_s1 = inlined_call_operand.vmem [shape: f32[4,8,8], index: 1, kind: input, shape index: {}]   ;;  %s2462_s2 = inlined_call_operand.vmem [shape: f32[4,8,8], index: 2, kind: input, shape index: {}]   ;;  %s2463_s3 = inlined_call_operand.vmem [shape: f32[4,8,8], index: 3, kind: input, shape index: {}]   ;;  %s2464_s4 = inlined_call_operand.vmem [shape: f32[4,8,8], index: 4, kind: input, shape index: {}]   ;;  %s2465_s5 = inlined_call_operand.vmem [shape: f32[4,8,8], index: 5, kind: input, shape index: {}]   ;;  %s2466_s6 = inlined_call_operand.vmem [shape: f32[4,8,8], index: 6, kind: input, shape index: {}]   ;;  %s2467_s7 = inlined_call_operand.hbm [shape: f32[4,8,8], index: 7, kind: output, shape index: {}]  }
   0x1   :  { %v31_v0 = vld [vmem:[%s2463_s3] sm:$0xff]  ;;  %v32_v1 = vld [vmem:[%s2463_s3 + $0x8] sm:$0xff]  ;;  %2020 = vmatprep.subr.mxu0 %v2185_v2  ;;  %2025 = vmatprep.subr.mxu1 %v2185_v2  ;;  %v33_v5 = vld [vmem:[%s2463_s3 + $0x10] sm:$0xff] }
   0x2   :  { %v27_v3 = vld [vmem:[%s2460_s0] sm:$0xff]  ;;  %v28_v4 = vld [vmem:[%s2460_s0 + $0x8] sm:$0xff]  ;;  %2021 = vmatpush3.msra.mxu0 %v31_v0  ;;  %2022 = vmatprep.mubr.msk.f32.mxu0 %vm2186_vm1, %v2185_v2  ;;  %v34_v6 = vld [vmem:[%s2463_s3 + $0x18] sm:$0xff] }
   0x3   :  { %2026 = vmatpush3.msra.mxu1 %v32_v1  ;;  %2027 = vmatprep.mubr.msk.f32.mxu1 %vm2186_vm1, %v2185_v2  ;;  %v29_v7 = vld [vmem:[%s2460_s0 + $0x10] sm:$0xff]  ;;  %v30_v8 = vld [vmem:[%s2460_s0 + $0x18] sm:$0xff] }
   0x4   :  { %2023 = vmatmul.mubr.msk.f32.vlgmr.msra.gmra.mrb[0].mxu0 %vm35_vm0, %v27_v3  ;;  %2028 = vmatmul.mubr.msk.f32.vlgmr.msra.gmra.mrb[0].mxu1 %vm35_vm0, %v28_v4 }
   0x5   :  { %2030 = vmatprep.subr.mxu0 %v2185_v2  ;;  %2035 = vmatprep.subr.mxu1 %v2185_v2 }
   0x6   :  { %12 = vsyncpa [#allocation3], 0  ;;  %2031 = vmatpush3.msra.mxu0 %v33_v5  ;;  %2032 = vmatprep.mubr.msk.f32.mxu0 %vm2186_vm1, %v2185_v2  ;;  %v332_v9 = vld [vmem:[%s2464_s4] sm:$0xff]  ;;  %v333_v10 = vld [vmem:[%s2464_s4 + $0x8] sm:$0xff] }
   0x7   :  { %2036 = vmatpush3.msra.mxu1 %v34_v6  ;;  %2037 = vmatprep.mubr.msk.f32.mxu1 %vm2186_vm1, %v2185_v2  ;;  %v328_v11 = vld [vmem:[%s2461_s1] sm:$0xff]  ;;  %v329_v12 = vld [vmem:[%s2461_s1 + $0x8] sm:$0xff]  ;;  %v334_v13 = vld [vmem:[%s2464_s4 + $0x10] sm:$0xff] }
   0x8   :  { %2033 = vmatmul.mubr.msk.f32.vlgmr.msra.gmra.mrb[2].mxu0 %vm35_vm0, %v29_v7  ;;  %2038 = vmatmul.mubr.msk.f32.vlgmr.msra.gmra.mrb[2].mxu1 %vm35_vm0, %v30_v8  ;;  %v335_v14 = vld [vmem:[%s2464_s4 + $0x18] sm:$0xff]  ;;  %v330_v15 = vld [vmem:[%s2461_s1 + $0x10] sm:$0xff]  ;;  %v632_v17 = vld [vmem:[%s2465_s5] sm:$0xff] }
   0x9   :  { %2040 = vmatprep.subr.mxu0 %v2185_v2  ;;  %2045 = vmatprep.subr.mxu1 %v2185_v2  ;;  %v331_v16 = vld [vmem:[%s2461_s1 + $0x18] sm:$0xff]  ;;  %v633_v18 = vld [vmem:[%s2465_s5 + $0x8] sm:$0xff]  ;;  %v628_v19 = vld [vmem:[%s2462_s2] sm:$0xff] }
   0xa   :  { %2041 = vmatpush3.msra.mxu0 %v332_v9  ;;  %2042 = vmatprep.mubr.msk.f32.mxu0 %vm2186_vm1, %v2185_v2  ;;  %v629_v20 = vld [vmem:[%s2462_s2 + $0x8] sm:$0xff]  ;;  %v634_v21 = vld [vmem:[%s2465_s5 + $0x10] sm:$0xff]  ;;  %v635_v22 = vld [vmem:[%s2465_s5 + $0x18] sm:$0xff] }
   0xb   :  { %2046 = vmatpush3.msra.mxu1 %v333_v10  ;;  %2047 = vmatprep.mubr.msk.f32.mxu1 %vm2186_vm1, %v2185_v2  ;;  %v630_v23 = vld [vmem:[%s2462_s2 + $0x10] sm:$0xff]  ;;  %v631_v24 = vld [vmem:[%s2462_s2 + $0x18] sm:$0xff]  ;;  %v1232_v41 = vld [vmem:[%s2466_s6] sm:$0xff] }
   0xc   :  { %2043 = vmatmul.mubr.msk.f32.vlgmr.msra.gmra.mrb[4].mxu0 %vm35_vm0, %v328_v11  ;;  %2048 = vmatmul.mubr.msk.f32.vlgmr.msra.gmra.mrb[4].mxu1 %vm35_vm0, %v329_v12  ;;  %v1233_v50 = vld [vmem:[%s2466_s6 + $0x8] sm:$0xff]  ;;  %v1234_v51 = vld [vmem:[%s2466_s6 + $0x10] sm:$0xff]  ;;  %v1235_v52 = vld [vmem:[%s2466_s6 + $0x18] sm:$0xff]  ;;  %s2187_s6 = smov [#allocation2]  }
   0xd   :  { %2050 = vmatprep.subr.mxu0 %v2185_v2  ;;  %2055 = vmatprep.subr.mxu1 %v2185_v2  ;;  %s1933_s26 = sshll.u32 %s2187_s6, 4  ;;  %s1934_s26 = int_to_ptr.vmem [resolvable:$true] %s1933_s26 }
   0xe   :  { %2051 = vmatpush3.msra.mxu0 %v334_v13  ;;  %2052 = vmatprep.mubr.msk.f32.mxu0 %vm2186_vm1, %v2185_v2  ;;  %s2161_s27 = scalar_lea.vmem %s1934_s26, 512  ;;  %p2166_p1 = scmp.lt.s32.totalorder %s1934_s26, %s1934_s26 }
   0xf   :  { %2056 = vmatpush3.msra.mxu1 %v335_v14  ;;  %2057 = vmatprep.mubr.msk.f32.mxu1 %vm2186_vm1, %v2185_v2  ;;  %p2162_p0 = scmp.ne.s32.totalorder %s1934_s26, %s2161_s27  ;;  %p2167_p2 = scmp.lt.s32.totalorder %s2161_s27, %s2161_s27 }
  0x10   :  { %2053 = vmatmul.mubr.msk.f32.vlgmr.msra.gmra.mrb[6].mxu0 %vm35_vm0, %v330_v15  ;;  %2058 = vmatmul.mubr.msk.f32.vlgmr.msra.gmra.mrb[6].mxu1 %vm35_vm0, %v331_v16 }
  0x11   :  { %2060 = vmatprep.subr.mxu0 %v2185_v2  ;;  %2065 = vmatprep.subr.mxu1 %v2185_v2  ;;  %p2168_p3 = por %p2167_p2, %p2166_p1 }
  0x12   :  { %2061 = vmatpush3.msra.mxu0 %v632_v17  ;;  %2062 = vmatprep.mubr.msk.f32.mxu0 %vm2186_vm1, %v2185_v2 }
  0x13   :  { %2067 = vmatprep.mubr.msk.f32.mxu1 %vm2186_vm1, %v2185_v2  ;;  %2070 = vmatprep.subr.mxu0 %v2185_v2  ;;  %p2169_p4 = pnand %p2168_p3, %p2162_p0 }
  0x14   :  { %2066 = vmatpush3.msra.mxu1 %v633_v18  ;;  %2063 = vmatmul.mubr.msk.f32.vlgmr.msra.gmra.mrb[8].mxu0 %vm35_vm0, %v628_v19 }
  0x15   :  { %2075 = vmatprep.subr.mxu1 %v2185_v2  ;;  %2068 = vmatmul.mubr.msk.f32.vlgmr.msra.gmra.mrb[8].mxu1 %vm35_vm0, %v629_v20 }
  0x16   :  { %2071 = vmatpush3.msra.mxu0 %v634_v21  ;;  %2076 = vmatpush3.msra.mxu1 %v635_v22 }
  0x17   :  { %2072 = vmatprep.mubr.msk.f32.mxu0 %vm2186_vm1, %v2185_v2  ;;  %2077 = vmatprep.mubr.msk.f32.mxu1 %vm2186_vm1, %v2185_v2 }
  0x18   :  { %2080 = vmatprep.subr.mxu0 %v2185_v2  ;;  %2085 = vmatprep.subr.mxu1 %v2185_v2 }
  0x19   :  { %2073 = vmatmul.mubr.msk.f32.vlgmr.msra.gmra.mrb[10].mxu0 %vm35_vm0, %v630_v23  ;;  %2078 = vmatmul.mubr.msk.f32.vlgmr.msra.gmra.mrb[10].mxu1 %vm35_vm0, %v631_v24 }
  0x1a   :  { %2082 = vmatprep.mubr.msk.f32.mxu0 %vm2186_vm1, %v2185_v2  ;;  %2087 = vmatprep.mubr.msk.f32.mxu1 %vm2186_vm1, %v2185_v2 }
  0xd7   :  { %v105_v25 = vpop.f32.mrb[0].mxu0  ;;  %v178_v26 = vpop.f32.mrb[0].mxu1 }
  0xd8   :  { %v2024_v27 = vpop.f32.mrb[1].mxu0  ;;  %v2029_v28 = vpop.f32.mrb[1].mxu1 }
  0xdb   :  { %v251_v29 = vpop.f32.mrb[2].mxu0  ;;  %v324_v30 = vpop.f32.mrb[2].mxu1 }
  0xdc   :  { %v2034_v31 = vpop.f32.mrb[3].mxu0  ;;  %v2039_v32 = vpop.f32.mrb[3].mxu1 }
  0xdf   :  { %v405_v33 = vpop.f32.mrb[4].mxu0  ;;  %v478_v34 = vpop.f32.mrb[4].mxu1 }
  0xe0   :  { %v2044_v35 = vpop.f32.mrb[5].mxu0  ;;  %2081 = vmatpush3.xpose.msk.msra.mxu0 %vm35_vm0, %v405_v33  ;;  %2086 = vmatpush3.xpose.msk.msra.mxu1 %vm35_vm0, %v478_v34  ;;  %v2049_v36 = vpop.f32.mrb[5].mxu1 }
  0xe1   :  { %2090 = vmatprep.subr.mxu0 %v2185_v2  ;;  %2095 = vmatprep.subr.mxu1 %v2185_v2 }
  0xe3   :  { %v551_v37 = vpop.f32.mrb[6].mxu0  ;;  %v624_v38 = vpop.f32.mrb[6].mxu1  ;;  %2083 = vmatmul.mubr.msk.f32.vlgmr.msra.gmra.mrb[12].mxu0 %vm35_vm0, %v105_v25  ;;  %2088 = vmatmul.mubr.msk.f32.vlgmr.msra.gmra.mrb[12].mxu1 %vm35_vm0, %v178_v26 }
  0xe4   :  { %v2054_v39 = vpop.f32.mrb[7].mxu0  ;;  %2091 = vmatpush3.xpose.msk.msra.mxu0 %vm35_vm0, %v551_v37  ;;  %2096 = vmatpush3.xpose.msk.msra.mxu1 %vm35_vm0, %v624_v38  ;;  %v2059_v40 = vpop.f32.mrb[7].mxu1 }
  0xe5   :  { %2092 = vmatprep.mubr.msk.f32.mxu0 %vm2186_vm1, %v2185_v2  ;;  %2097 = vmatprep.mubr.msk.f32.mxu1 %vm2186_vm1, %v2185_v2 }
  0xe6   :  { %2100 = vmatprep.subr.mxu0 %v2185_v2  ;;  %2105 = vmatprep.subr.mxu1 %v2185_v2 }
  0xe7   :  { %2093 = vmatmul.mubr.msk.f32.vlgmr.msra.gmra.mrb[14].mxu0 %vm35_vm0, %v251_v29  ;;  %2098 = vmatmul.mubr.msk.f32.vlgmr.msra.gmra.mrb[14].mxu1 %vm35_vm0, %v324_v30  ;;  %v705_v42 = vpop.f32.mrb[8].mxu0  ;;  %v1572_v30 = vlaneseq }
  0xe8   :  { %2101 = vmatpush3.msra.mxu0 %v1232_v41  ;;  %2102 = vmatprep.mubr.msk.f32.mxu0 %vm2186_vm1, %v2185_v2  ;;  %v2064_v43 = vpop.f32.mrb[9].mxu0  ;;  %v778_v44 = vpop.f32.mrb[8].mxu1 }
  0xe9   :  { %2107 = vmatprep.mubr.msk.f32.mxu1 %vm2186_vm1, %v2185_v2  ;;  %2110 = vmatprep.subr.mxu0 %v2185_v2  ;;  %v2069_v45 = vpop.f32.mrb[9].mxu1  ;;  %v1573_v31 = vshrl.u32 %v1572_v30, 7  ;;  %v1575_v32 = vand.u32 127, %v1572_v30 }
  0xea   :  { %2106 = vmatpush3.msra.mxu1 %v1233_v50 }
  0xeb   :  { %2115 = vmatprep.subr.mxu1 %v2185_v2  ;;  %v1576_v33 = vmul.u32 8, %v1573_v31 }
  0xec   :  { %v2380_v46 = vpop.f32.mrb[10].mxu0  ;;  %v2382_v48 = vpop.f32.mrb[10].mxu1 }
  0xed   :  { %v2074_v47 = vpop.f32.mrb[11].mxu0  ;;  %v2079_v49 = vpop.f32.mrb[11].mxu1  ;;  %v1580_v34 = vadd.s32 %v1576_v33, %v1575_v32  ;;  %v1577_v35 = vadd.s32 64, %v1576_v33  ;;  %v1578_v36 = vadd.s32 128, %v1576_v33  ;;  %v1579_v39 = vadd.s32 192, %v1576_v33 }
  0xef   :  { %v1584_v37 = vmul.u32 2654435769, %v1580_v34  ;;  %v1581_v38 = vadd.s32 %v1577_v35, %v1575_v32  ;;  %v1582_v40 = vadd.s32 %v1578_v36, %v1575_v32  ;;  %v1583_v43 = vadd.s32 %v1579_v39, %v1575_v32 }
  0xf1   :  { %v1588_v41 = vadd.s32 1234, %v1584_v37  ;;  %v1587_v49 = vmul.u32 2654435769, %v1583_v43 }
  0xf3   :  { %v1592_v45 = vshrl.u32 %v1588_v41, 16 }
 0x1b6   :  { %v1000_v53 = vpop.f32.mrb[12].mxu0  ;;  %v1076_v54 = vpop.f32.mrb[12].mxu1 }
 0x1b7   :  { %v2084_v55 = vpop.f32.mrb[13].mxu0  ;;  %v2089_v56 = vpop.f32.mrb[13].mxu1  ;;  %2103 = vmatmul.mubr.msk.f32.vlgmr.msra.gmra.mrb[16].mxu0 %vm35_vm0, %v1000_v53  ;;  %2108 = vmatmul.mubr.msk.f32.vlgmr.msra.gmra.mrb[16].mxu1 %vm35_vm0, %v1076_v54  ;;  %v1591_v53 = vadd.s32 1234, %v1587_v49 }
 0x1b8   :  { %2111 = vmatpush3.msra.mxu0 %v1234_v51  ;;  %2116 = vmatpush3.msra.mxu1 %v1235_v52  ;;  %v1596_v51 = vxor.u32 %v1592_v45, %v1588_v41 }
 0x1b9   :  { %2112 = vmatprep.mubr.msk.f32.mxu0 %vm2186_vm1, %v2185_v2  ;;  %2117 = vmatprep.mubr.msk.f32.mxu1 %vm2186_vm1, %v2185_v2 }
 0x1ba   :  { %v1152_v57 = vpop.f32.mrb[14].mxu0  ;;  %v1228_v58 = vpop.f32.mrb[14].mxu1  ;;  %2120 = vmatprep.subr.mxu0 %v2185_v2  ;;  %2125 = vmatprep.subr.mxu1 %v2185_v2  ;;  %v1600_v55 = vmul.u32 2146121005, %v1596_v51 }
 0x1bb   :  { %v2094_v59 = vpop.f32.mrb[15].mxu0  ;;  %v2099_v60 = vpop.f32.mrb[15].mxu1  ;;  %2113 = vmatmul.mubr.msk.f32.vlgmr.msra.gmra.mrb[18].mxu0 %vm35_vm0, %v1152_v57  ;;  %2118 = vmatmul.mubr.msk.f32.vlgmr.msra.gmra.mrb[18].mxu1 %vm35_vm0, %v1228_v58  ;;  %v1595_v57 = vshrl.u32 %v1591_v53, 16 }
 0x1bc   :  { %2121 = vmatpush3.msra.mxu0 %v705_v42  ;;  %2126 = vmatpush3.msra.mxu1 %v778_v44  ;;  %v1585_v42 = vmul.u32 2654435769, %v1581_v38  ;;  %v1586_v44 = vmul.u32 2654435769, %v1582_v40  ;;  %v1604_v59 = vshrl.u32 %v1600_v55, 15 }
 0x1bd   :  { %2122 = vmatprep.mubr.msk.f32.mxu0 %vm2186_vm1, %v2185_v2  ;;  %2130 = vmatprep.subr.mxu0 %v2185_v2 }
 0x1be   :  { %2127 = vmatprep.mubr.msk.f32.mxu1 %vm2186_vm1, %v2185_v2  ;;  %2135 = vmatprep.subr.mxu1 %v2185_v2  ;;  %v1589_v47 = vadd.s32 1234, %v1585_v42  ;;  %v1590_v50 = vadd.s32 1234, %v1586_v44 }
 0x1c0   :  { %v1593_v52 = vshrl.u32 %v1589_v47, 16  ;;  %v1594_v54 = vshrl.u32 %v1590_v50, 16 }
 0x1c2   :  { %v1597_v56 = vxor.u32 %v1593_v52, %v1589_v47  ;;  %v1598_v58 = vxor.u32 %v1594_v54, %v1590_v50 }
 0x1c4   :  { %v1601_v60 = vmul.u32 2146121005, %v1597_v56 }
 0x28a   :  { %v1305_v61 = vpop.f32.mrb[16].mxu0  ;;  %v1378_v62 = vpop.f32.mrb[16].mxu1 }
 0x28b   :  { %v2104_v63 = vpop.f32.mrb[17].mxu0  ;;  %v2109_v0 = vpop.f32.mrb[17].mxu1  ;;  %v1528_v1 = vsel %vm35_vm0, %v1305_v61, -inf  ;;  %v1531_v7 = vsel %vm35_vm0, %v1378_v62, -inf }
 0x28c   :  { %1529 = vmax.xlane.f32.xlu0 %v1528_v1  ;;  %v1608_v63 = vxor.u32 %v1604_v59, %v1600_v55  ;;  %v1605_v0 = vshrl.u32 %v1601_v60, 15 }
 0x28e   :  { %v1451_v3 = vpop.f32.mrb[18].mxu0  ;;  %v1524_v4 = vpop.f32.mrb[18].mxu1 }
 0x28f   :  { %v2114_v5 = vpop.f32.mrb[19].mxu0  ;;  %v2119_v6 = vpop.f32.mrb[19].mxu1  ;;  %v1534_v8 = vsel %vm35_vm0, %v1451_v3, -inf  ;;  %v1537_v9 = vsel %vm35_vm0, %v1524_v4, -inf }
 0x290   :  { %1532 = vmax.xlane.f32.xlu0 %v1531_v7  ;;  %1535 = vmax.xlane.f32.xlu1 %v1534_v8  ;;  %v1609_v5 = vxor.u32 %v1605_v0, %v1601_v60 }
 0x294   :  { %1538 = vmax.xlane.f32.xlu1 %v1537_v9 }
 0x319   :  { %v1530_v10 = vpop.xlane.xlu0 %1529 }
 0x31a   :  { %v1540_v11 = vsub.f32 %v1305_v61, %v1530_v10  ;;  %v1599_v61 = vxor.u32 %v1595_v57, %v1591_v53  ;;  %v1613_v10 = vmul.u32 2221713035, %v1609_v5 }
 0x31c   :  { %v1544_v12 = vmul.f32 1.442695, %v1540_v11  ;;  %v1603_v1 = vmul.u32 2146121005, %v1599_v61 }
 0x31d   :  { %v1533_v13 = vpop.xlane.xlu0 %1532  ;;  %v1536_v14 = vpop.xlane.xlu1 %1535 }
 0x31e   :  { %2145 = vpow2.f32 %v1544_v12  ;;  %v1541_v15 = vsub.f32 %v1378_v62, %v1533_v13  ;;  %v1542_v16 = vsub.f32 %v1451_v3, %v1536_v14  ;;  %v1602_v62 = vmul.u32 2146121005, %v1598_v58 }
 0x31f   :  { %v1607_v6 = vshrl.u32 %v1603_v1, 15 }
 0x320   :  { %v1546_v17 = vmul.f32 1.442695, %v1541_v15  ;;  %v1548_v18 = vmul.f32 1.442695, %v1542_v16  ;;  %v1606_v3 = vshrl.u32 %v1602_v62, 15  ;;  %v1617_v16 = vshrl.u32 %v1613_v10, 16 }
 0x321   :  { %v1539_v19 = vpop.xlane.xlu1 %1538  ;;  %v1611_v11 = vxor.u32 %v1607_v6, %v1603_v1 }
 0x322   :  { %2147 = vpow2.f32 %v1546_v17  ;;  %v1543_v20 = vsub.f32 %v1524_v4, %v1539_v19  ;;  %v1612_v4 = vmul.u32 2221713035, %v1608_v63  ;;  %v1610_v8 = vxor.u32 %v1606_v3, %v1602_v62 }
 0x323   :  { %2149 = vpow2.f32 %v1548_v18  ;;  %v1615_v17 = vmul.u32 2221713035, %v1611_v11 }
 0x324   :  { %v1550_v21 = vmul.f32 1.442695, %v1543_v20  ;;  %v1616_v9 = vshrl.u32 %v1612_v4, 16  ;;  %v1614_v13 = vmul.u32 2221713035, %v1610_v8 }
 0x326   :  { %2151 = vpow2.f32 %v1550_v21  ;;  %v1620_v15 = vxor.u32 %v1616_v9, %v1612_v4  ;;  %v1618_v19 = vshrl.u32 %v1614_v13, 16  ;;  %v1621_v21 = vxor.u32 %v1617_v16, %v1613_v10 }
 0x328   :  { %v2414_v22 = vpop.eup %2145  ;;  %vm1624_vm2 = vcmp.ge.u32.totalorder %v1620_v15, 2147483648  ;;  %vm1625_vm3 = vcmp.ge.u32.totalorder %v1621_v21, 2147483648 }
 0x329   :  { %v1552_v23 = vsel %vm35_vm0, %v2414_v22, 0.0 }
 0x32a   :  { %1553 = vadd.xlane.f32.xlu0 %v1552_v23  ;;  %v1619_v23 = vshrl.u32 %v1615_v17, 16 }
 0x32c   :  { %v2418_v24 = vpop.eup %2147  ;;  %v1623_v31 = vxor.u32 %v1619_v23, %v1615_v17 }
 0x32d   :  { %v2420_v25 = vpop.eup %2149  ;;  %v1555_v26 = vsel %vm35_vm0, %v2418_v24, 0.0 }
 0x32e   :  { %1556 = vadd.xlane.f32.xlu1 %v1555_v26  ;;  %v1558_v27 = vsel %vm35_vm0, %v2420_v25, 0.0  ;;  %vm1627_vm5 = vcmp.ge.u32.totalorder %v1623_v31, 2147483648 }
 0x32f   :  { %1559 = vadd.xlane.f32.xlu0 %v1558_v27  ;;  %v1622_v27 = vxor.u32 %v1618_v19, %v1614_v13 }
 0x330   :  { %v2426_v28 = vpop.eup %2151 }
 0x331   :  { %v1561_v29 = vsel %vm35_vm0, %v2426_v28, 0.0  ;;  %vm1626_vm4 = vcmp.ge.u32.totalorder %v1622_v27, 2147483648 }
 0x332   :  { %1562 = vadd.xlane.f32.xlu1 %v1561_v29 }
 0x3b7   :  { %v1554_v7 = vpop.xlane.xlu0 %1553 }
 0x3b8   :  { %2153 = vrcp.f32 %v1554_v7 }
 0x3bb   :  { %v1557_v12 = vpop.xlane.xlu1 %1556 }
 0x3bc   :  { %v1560_v14 = vpop.xlane.xlu0 %1559  ;;  %2155 = vrcp.f32 %v1557_v12 }
 0x3bd   :  { %2157 = vrcp.f32 %v1560_v14 }
 0x3bf   :  { %v1563_v18 = vpop.xlane.xlu1 %1562 }
 0x3c0   :  { %2159 = vrcp.f32 %v1563_v18 }
 0x3c2   :  { %v2154_v20 = vpop.eup %2153 }
 0x3c3   :  { %v1565_v26 = vmul.f32 %v2154_v20, %v2414_v22 }
 0x3c5   :  { %v1628_v29 = vsel %vm1624_vm2, %v1565_v26, 0.0 }
 0x3c6   :  { %v2156_v30 = vpop.eup %2155  ;;  %2123 = vmatmul.mubr.msk.f32.vlgmr.msra.gmra.mrb[20].mxu0 %vm35_vm0, %v1628_v29 }
 0x3c7   :  { %v2158_v32 = vpop.eup %2157  ;;  %2131 = vmatpush3.msra.mxu0 %v2380_v46  ;;  %2132 = vmatprep.mubr.msk.f32.mxu0 %vm2186_vm1, %v2185_v2  ;;  %v1567_v33 = vmul.f32 %v2156_v30, %v2418_v24 }
 0x3c8   :  { %v1569_v34 = vmul.f32 %v2158_v32, %v2420_v25 }
 0x3c9   :  { %v1629_v35 = vsel %vm1625_vm3, %v1567_v33, 0.0 }
 0x3ca   :  { %v2160_v22 = vpop.eup %2159  ;;  %2128 = vmatmul.mubr.msk.f32.vlgmr.msra.gmra.mrb[20].mxu1 %vm35_vm0, %v1629_v35  ;;  %v1630_v36 = vsel %vm1626_vm4, %v1569_v34, 0.0 }
 0x3cb   :  { %2133 = vmatmul.mubr.msk.f32.vlgmr.msra.gmra.mrb[22].mxu0 %vm35_vm0, %v1630_v36  ;;  %2136 = vmatpush3.msra.mxu1 %v2382_v48  ;;  %v1571_v46 = vmul.f32 %v2160_v22, %v2426_v28 }
 0x3cc   :  { %2137 = vmatprep.mubr.msk.f32.mxu1 %vm2186_vm1, %v2185_v2 }
 0x3cd   :  { %v1631_v37 = vsel %vm1627_vm5, %v1571_v46, 0.0 }
 0x3ce   :  { %2138 = vmatmul.mubr.msk.f32.vlgmr.msra.gmra.mrb[22].mxu1 %vm35_vm0, %v1631_v37 }
 0x499   :  { %v1701_v24 = vpop.f32.mrb[20].mxu0 }
 0x49a   :  { %1924 = vst.msk [vmem:[#allocation2] sm:$0xff] %vm35_vm0, %v1701_v24  ;;  %v2124_v25 = vpop.f32.mrb[21].mxu0 }
 0x49d   :  { %v1774_v38 = vpop.f32.mrb[20].mxu1 }
 0x49e   :  { %1925 = vst.msk [vmem:[#allocation2 + $0x8] sm:$0xff] %vm35_vm0, %v1774_v38  ;;  %v1847_v39 = vpop.f32.mrb[22].mxu0  ;;  %v2129_v40 = vpop.f32.mrb[21].mxu1 }
 0x49f   :  { %1926 = vst.msk [vmem:[#allocation2 + $0x10] sm:$0xff] %vm35_vm0, %v1847_v39  ;;  %v2134_v48 = vpop.f32.mrb[23].mxu0 }
 0x4a1   :  { %v1920_v28 = vpop.f32.mrb[22].mxu1 }
 0x4a2   :  { %1927 = vst.msk [vmem:[#allocation2 + $0x18] sm:$0xff] %vm35_vm0, %v1920_v28  ;;  %v2139_v2 = vpop.f32.mrb[23].mxu1 }
 0x4a3   :  { %2172 = shalt.err (!%p2169_p4)
}
 0x4a4   :  { %s2173_s30 = scalar_lea.hbm %s2467_s7, 512 }
 0x4a5   :  { %p2174_p5 = scmp.ne.s32.totalorder %s2467_s7, %s2173_s30  ;;  %p2177_p6 = scmp.lt.u32.totalorder %s2173_s30, %s2467_s7 }
 0x4a7   :  { %p2179_p7 = pnand %p2177_p6, %p2174_p5 }
 0x4a9   :  { %2182 = shalt.err (!%p2179_p7)
}
 0x4aa   :  { %s2188_s10 = smov 128   ;;  %s2189_s11 = smov 8  }
 0x4ab   :  { %1939 = dma.vmem_to_hbm [thread:$0]  %s1934_s26, 512, %s2467_s7, [#allocation3], %s2188_s10, %s2188_s10, %s2189_s11  }
 0x4ac   :  { %2183 = dma.done.wait [#allocation3], 512  }
 0x4ad   :  { %2184 = vsyncadd [#allocation3], 4294966784 }
 0x4ae   :  { %1943 = vsyncpa [#allocation3], 1 }

</bundles_post_ra>
